<compile_context>
chip_gen: v5e
topology: v5e:2x2
jax: 0.10.0
libtpu: 0.0.40
codegen_flags: <defaults>
</compile_context>

<pallas_src>
import jax
import jax.numpy as jnp
from jax.experimental import pallas as pl
from jax.experimental.pallas import tpu as pltpu

HIDDEN = 512          # "no_nodes" in the PyTorch module
MAX_TB = 2048         # max batch tile (rows)
LANE = 128            # TPU lane width


def _round_up(n: int, m: int) -> int:
    return ((n + m - 1) // m) * m


def _mlp_kernel(x_ref, w1_ref, b1_ref, w2_ref, b2_ref, w3_ref, b3_ref, o_ref):
    # x tile arrives f32; cast to bf16 in-kernel (saves a wrapper HBM pass).
    x = x_ref[...].astype(jnp.bfloat16)

    # layer1 + ReLU   (f32 accumulation on the MXU)
    h1 = jnp.dot(x, w1_ref[...], preferred_element_type=jnp.float32)
    h1 = jnp.maximum(h1 + b1_ref[...], 0.0)                      # (TB, 512) f32

    # layer2 + ReLU
    h2 = jnp.dot(h1.astype(jnp.bfloat16), w2_ref[...],
                 preferred_element_type=jnp.float32)
    h2 = jnp.maximum(h2 + b2_ref[...], 0.0)                      # (TB, 512) f32

    # layer3 (no activation), lane-padded output columns
    out = jnp.dot(h2.astype(jnp.bfloat16), w3_ref[...],
                  preferred_element_type=jnp.float32)
    o_ref[...] = (out + b3_ref[...]).astype(o_ref.dtype)         # (TB, out_p)


def prepare_params(params):
    """One-time (outside the hot path) param conversion:
       * weights -> bf16 in (in_features, out_features) layout
       * layer-3 weight/bias zero-padded to a lane-dense 128-col output.
    Returns (kernel_params, out_dim)."""
    w1, b1, w2, b2, w3, b3 = params
    out_dim = w3.shape[1]
    out_p = _round_up(max(out_dim, LANE), LANE)
    if out_p != out_dim:
        w3 = jnp.pad(w3, ((0, 0), (0, out_p - out_dim)))
        b3 = jnp.pad(b3, ((0, 0), (0, out_p - out_dim)))
    kernel_params = (
        w1.astype(jnp.bfloat16), b1.astype(jnp.float32),
        w2.astype(jnp.bfloat16), b2.astype(jnp.float32),
        w3.astype(jnp.bfloat16), b3.astype(jnp.float32),
    )
    return kernel_params, out_dim


def feedforward_nn_512(x, kernel_params, out_dim):
    """Fused forward pass.  x: (B, in_dim) f32.  Returns (B, out_dim) f32."""
    w1, b1, w2, b2, w3, b3 = kernel_params
    B, in_dim = x.shape
    out_p = w3.shape[1]                      # lane-padded output width (>=128)

    # Batch tile.  No activation padding: the ragged last block (B % TB != 0)
    # is masked on writeback by Mosaic; padded-row reads are garbage but each
    # output row depends only on its own input row and is never written.
    if B <= 8:
        TB = B                               # block == full batch dim (legal)
    else:
        # >=2 grid steps whenever possible so the "parallel" batch axis can
        # be sharded across both TensorCores on v7x; sublane-aligned.
        TB = min(MAX_TB, _round_up(-(-B // 2), 8))
    grid = (pl.cdiv(B, TB),)

    def resident(shape):
        # Constant index_map -> same block every grid step -> params stay
        # resident in VMEM (single HBM->VMEM DMA for the whole call).
        return pl.BlockSpec(shape, lambda i: (0, 0))

    flops = 2 * B * (in_dim * HIDDEN + HIDDEN * HIDDEN + HIDDEN * out_p)
    bytes_accessed = (
        B * in_dim * 4                                   # x (f32 in)
        + (w1.size + w2.size + w3.size) * 2              # bf16 weights
        + (b1.size + b2.size + b3.size) * 4              # f32 biases
        + B * out_p * 4                                  # f32 out
    )

    out = pl.pallas_call(
        _mlp_kernel,
        out_shape=jax.ShapeDtypeStruct((B, out_p), jnp.float32),
        grid=grid,
        in_specs=[
            pl.BlockSpec((TB, in_dim), lambda i: (i, 0)),   # x: batch-tiled
            resident((in_dim, HIDDEN)),                      # w1
            resident((1, HIDDEN)),                           # b1
            resident((HIDDEN, HIDDEN)),                      # w2
            resident((1, HIDDEN)),                           # b2
            resident((HIDDEN, out_p)),                       # w3 (lane padded)
            resident((1, out_p)),                            # b3 (lane padded)
        ],
        out_specs=pl.BlockSpec((TB, out_p), lambda i: (i, 0)),
        compiler_params=pltpu.CompilerParams(
            dimension_semantics=("parallel",),               # megacore on v7x
            vmem_limit_bytes=48 * 1024 * 1024,               # fits v7x 64 MiB
        ),
        cost_estimate=pl.CostEstimate(
            flops=flops, transcendentals=0, bytes_accessed=bytes_accessed),
    )(x, w1, b1, w2, b2, w3, b3)

    if out_p != out_dim:
        out = out[:, :out_dim]
    return out


def init_params(key, in_dim, out_dim):
    """PyTorch-Linear-style uniform fan-in init.

    Weights returned as (in_features, out_features); biases as (1, out)."""
    ks = jax.random.split(key, 6)

    def linear(kw, kb, fan_in, fan_out):
        bound = 1.0 / jnp.sqrt(fan_in)
        w = jax.random.uniform(kw, (fan_in, fan_out), jnp.float32, -bound, bound)
        b = jax.random.uniform(kb, (1, fan_out), jnp.float32, -bound, bound)
        return w, b

    w1, b1 = linear(ks[0], ks[1], in_dim, HIDDEN)
    w2, b2 = linear(ks[2], ks[3], HIDDEN, HIDDEN)
    w3, b3 = linear(ks[4], ks[5], HIDDEN, out_dim)
    return (w1, b1, w2, b2, w3, b3)


def _reference(x, params):
    """Pure-JAX f32 reference matching the PyTorch module's forward."""
    w1, b1, w2, b2, w3, b3 = params
    h1 = jnp.maximum(x @ w1 + b1, 0.0)
    h2 = jnp.maximum(h1 @ w2 + b2, 0.0)
    return h2 @ w3 + b3


if __name__ == "__main__":
    key = jax.random.PRNGKey(0)
    k_in, k_param = jax.random.split(key)

    batch, in_dim, out_dim = 2, 16, 8
    obs = jax.random.normal(k_in, (batch, in_dim), dtype=jnp.float32)
    params = init_params(k_param, in_dim, out_dim)

    # One-time parameter prep (bf16 cast + lane padding) outside the hot path.
    kernel_params, out_dim = prepare_params(params)
    kernel_params = jax.block_until_ready(kernel_params)

    out = feedforward_nn_512(obs, kernel_params, out_dim)
    out = jax.block_until_ready(out)

    ref = _reference(obs, params)
    assert out.shape == (batch, out_dim)
    # Tolerance relaxed vs. pure-f32: weights/activations enter the MXU in
    # bf16 (accumulation stays f32).
    assert jnp.allclose(out, ref, atol=2e-2, rtol=2e-2), (
        f"max abs err {jnp.max(jnp.abs(out - ref))}")

    print("KERNEL_OK")
</pallas_src>

<mosaic_0001>
module attributes {stable_mosaic.version = 11 : i64} {
  func.func @_mlp_kernel(%arg0: i32, %arg1: memref<2x16xf32, #tpu.memory_space<vmem>>, %arg2: memref<16x512xbf16, #tpu.memory_space<vmem>>, %arg3: memref<1x512xf32, #tpu.memory_space<vmem>>, %arg4: memref<512x512xbf16, #tpu.memory_space<vmem>>, %arg5: memref<1x512xf32, #tpu.memory_space<vmem>>, %arg6: memref<512x128xbf16, #tpu.memory_space<vmem>>, %arg7: memref<1x128xf32, #tpu.memory_space<vmem>>, %arg8: memref<2x128xf32, #tpu.memory_space<vmem>>) attributes {dimension_semantics = [#tpu.dimension_semantics<parallel>], iteration_bounds = array<i64: 1>, scalar_prefetch = 0 : i64, scratch_operands = 0 : i64, tpu.core_type = #tpu.core_type<tc>, window_params = [{transform_indices = @transform_0, window_bounds = array<i64: 2, 16>}, {pipeline_mode = #tpu.pipeline_mode<synchronous>, transform_indices = @transform_1, window_bounds = array<i64: 16, 512>}, {pipeline_mode = #tpu.pipeline_mode<synchronous>, transform_indices = @transform_2, window_bounds = array<i64: 1, 512>}, {pipeline_mode = #tpu.pipeline_mode<synchronous>, transform_indices = @transform_3, window_bounds = array<i64: 512, 512>}, {pipeline_mode = #tpu.pipeline_mode<synchronous>, transform_indices = @transform_4, window_bounds = array<i64: 1, 512>}, {pipeline_mode = #tpu.pipeline_mode<synchronous>, transform_indices = @transform_5, window_bounds = array<i64: 512, 128>}, {pipeline_mode = #tpu.pipeline_mode<synchronous>, transform_indices = @transform_6, window_bounds = array<i64: 1, 128>}, {transform_indices = @transform_7, window_bounds = array<i64: 2, 128>}]} {
    %c0 = arith.constant 0 : index
    %c0_0 = arith.constant 0 : index
    %0 = vector.load %arg1[%c0, %c0_0] : memref<2x16xf32, #tpu.memory_space<vmem>>, vector<2x16xf32>
    %1 = arith.truncf %0 : vector<2x16xf32> to vector<2x16xbf16>
    %c0_1 = arith.constant 0 : index
    %c0_2 = arith.constant 0 : index
    %2 = vector.load %arg2[%c0_1, %c0_2] : memref<16x512xbf16, #tpu.memory_space<vmem>>, vector<16x512xbf16>
    %cst = arith.constant dense<0.000000e+00> : vector<2x512xf32>
    %3 = tpu.matmul %1, %2, %cst {dimension_numbers = #tpu.dot_dimension_numbers<[1], [0], [0], [1], [0, 0, 1, 1], [], []>} : vector<2x16xbf16>, vector<16x512xbf16>, vector<2x512xf32> -> vector<2x512xf32>
    %c0_3 = arith.constant 0 : index
    %c0_4 = arith.constant 0 : index
    %4 = vector.load %arg3[%c0_3, %c0_4] : memref<1x512xf32, #tpu.memory_space<vmem>>, vector<1x512xf32>
    %5 = vector.broadcast %4 : vector<1x512xf32> to vector<2x512xf32>
    %6 = arith.addf %3, %5 : vector<2x512xf32>
    %cst_5 = arith.constant 0.000000e+00 : f32
    %7 = vector.broadcast %cst_5 : f32 to vector<2x512xf32>
    %8 = arith.maximumf %6, %7 : vector<2x512xf32>
    %9 = arith.truncf %8 : vector<2x512xf32> to vector<2x512xbf16>
    %c0_6 = arith.constant 0 : index
    %c0_7 = arith.constant 0 : index
    %10 = vector.load %arg4[%c0_6, %c0_7] : memref<512x512xbf16, #tpu.memory_space<vmem>>, vector<512x512xbf16>
    %cst_8 = arith.constant dense<0.000000e+00> : vector<2x512xf32>
    %11 = tpu.matmul %9, %10, %cst_8 {dimension_numbers = #tpu.dot_dimension_numbers<[1], [0], [0], [1], [0, 0, 1, 1], [], []>} : vector<2x512xbf16>, vector<512x512xbf16>, vector<2x512xf32> -> vector<2x512xf32>
    %c0_9 = arith.constant 0 : index
    %c0_10 = arith.constant 0 : index
    %12 = vector.load %arg5[%c0_9, %c0_10] : memref<1x512xf32, #tpu.memory_space<vmem>>, vector<1x512xf32>
    %13 = vector.broadcast %12 : vector<1x512xf32> to vector<2x512xf32>
    %14 = arith.addf %11, %13 : vector<2x512xf32>
    %cst_11 = arith.constant 0.000000e+00 : f32
    %15 = vector.broadcast %cst_11 : f32 to vector<2x512xf32>
    %16 = arith.maximumf %14, %15 : vector<2x512xf32>
    %17 = arith.truncf %16 : vector<2x512xf32> to vector<2x512xbf16>
    %c0_12 = arith.constant 0 : index
    %c0_13 = arith.constant 0 : index
    %18 = vector.load %arg6[%c0_12, %c0_13] : memref<512x128xbf16, #tpu.memory_space<vmem>>, vector<512x128xbf16>
    %cst_14 = arith.constant dense<0.000000e+00> : vector<2x128xf32>
    %19 = tpu.matmul %17, %18, %cst_14 {dimension_numbers = #tpu.dot_dimension_numbers<[1], [0], [0], [1], [0, 0, 1, 1], [], []>} : vector<2x512xbf16>, vector<512x128xbf16>, vector<2x128xf32> -> vector<2x128xf32>
    %c0_15 = arith.constant 0 : index
    %c0_16 = arith.constant 0 : index
    %20 = vector.load %arg7[%c0_15, %c0_16] : memref<1x128xf32, #tpu.memory_space<vmem>>, vector<1x128xf32>
    %21 = vector.broadcast %20 : vector<1x128xf32> to vector<2x128xf32>
    %22 = arith.addf %19, %21 : vector<2x128xf32>
    %c0_17 = arith.constant 0 : index
    %c0_18 = arith.constant 0 : index
    %23 = vector.load %arg8[%c0_17, %c0_18] : memref<2x128xf32, #tpu.memory_space<vmem>>, vector<2x128xf32>
    tpu.vector_store %arg8[%c0_17, %c0_18], %22 {strides = array<i32>} : memref<2x128xf32, #tpu.memory_space<vmem>>, vector<2x128xf32>,
    return
  }
  func.func @transform_0(%arg0: i32) -> (i32, i32) {
    %c0_i32 = arith.constant 0 : i32
    %c0_i32_0 = arith.constant 0 : i32
    return %arg0, %c0_i32 : i32, i32
  }
  func.func @transform_1(%arg0: i32) -> (i32, i32) {
    %c0_i32 = arith.constant 0 : i32
    %c0_i32_0 = arith.constant 0 : i32
    %c0_i32_1 = arith.constant 0 : i32
    return %c0_i32, %c0_i32_0 : i32, i32
  }
  func.func @transform_2(%arg0: i32) -> (i32, i32) {
    %c0_i32 = arith.constant 0 : i32
    %c0_i32_0 = arith.constant 0 : i32
    %c0_i32_1 = arith.constant 0 : i32
    return %c0_i32, %c0_i32_0 : i32, i32
  }
  func.func @transform_3(%arg0: i32) -> (i32, i32) {
    %c0_i32 = arith.constant 0 : i32
    %c0_i32_0 = arith.constant 0 : i32
    %c0_i32_1 = arith.constant 0 : i32
    return %c0_i32, %c0_i32_0 : i32, i32
  }
  func.func @transform_4(%arg0: i32) -> (i32, i32) {
    %c0_i32 = arith.constant 0 : i32
    %c0_i32_0 = arith.constant 0 : i32
    %c0_i32_1 = arith.constant 0 : i32
    return %c0_i32, %c0_i32_0 : i32, i32
  }
  func.func @transform_5(%arg0: i32) -> (i32, i32) {
    %c0_i32 = arith.constant 0 : i32
    %c0_i32_0 = arith.constant 0 : i32
    %c0_i32_1 = arith.constant 0 : i32
    return %c0_i32, %c0_i32_0 : i32, i32
  }
  func.func @transform_6(%arg0: i32) -> (i32, i32) {
    %c0_i32 = arith.constant 0 : i32
    %c0_i32_0 = arith.constant 0 : i32
    %c0_i32_1 = arith.constant 0 : i32
    return %c0_i32, %c0_i32_0 : i32, i32
  }
  func.func @transform_7(%arg0: i32) -> (i32, i32) {
    %c0_i32 = arith.constant 0 : i32
    %c0_i32_0 = arith.constant 0 : i32
    return %arg0, %c0_i32 : i32, i32
  }
}

</mosaic_0001>

<bundles_post_ra>
// kernel: tpu_custom_call.1
= control target key start
LH: loop header
LB: loop body
LE: loop exit
PB: predicated region body
PF: predicated region fallthrough
CT: control target
= control target key end

     0   :  { %12 = vsyncpa [#allocation3], 0  ;;  %s2666_s0 = inlined_call_operand.hbm [shape: f32[2,16], index: 0, kind: input, shape index: {}]   ;;  %s2667_s1 = inlined_call_operand.hbm [shape: bf16[16,512], index: 1, kind: input, shape index: {}]   ;;  %s2668_s2 = inlined_call_operand.hbm [shape: f32[1,512], index: 2, kind: input, shape index: {}]   ;;  %s2669_s3 = inlined_call_operand.hbm [shape: bf16[512,512], index: 3, kind: input, shape index: {}]   ;;  %s2670_s4 = inlined_call_operand.hbm [shape: f32[1,512], index: 4, kind: input, shape index: {}]   ;;  %s2671_s5 = inlined_call_operand.hbm [shape: bf16[512,128], index: 5, kind: input, shape index: {}]   ;;  %s2672_s6 = inlined_call_operand.vmem [shape: f32[1,128], index: 6, kind: input, shape index: {}]   ;;  %s2673_s7 = inlined_call_operand.hbm [shape: f32[2,128], index: 7, kind: output, shape index: {}]  }
   0x1   :  { %13 = vsyncpa [#allocation6], 0 }
   0x2   :  { %14 = vsyncpa [#allocation9], 0 }
   0x3   :  { %15 = vsyncpa [#allocation12], 0  ;;  %s32_s26 = sshll.u32 %s2667_s1, 4  ;;  %s33_s26 = int_to_ptr.hbm [resolvable:$true] %s32_s26 }
   0x4   :  { %16 = vsyncpa [#allocation4], 0  ;;  %s2557_s27 = smov [#allocation5]   ;;  %s56_s8 = sshll.u32 %s2669_s3, 4  ;;  %s57_s8 = int_to_ptr.hbm [resolvable:$true] %s56_s8 }
   0x5   :  { %s34_s28 = sshll.u32 %s2557_s27, 4  ;;  %s2558_s9 = smov 256   ;;  %s35_s28 = int_to_ptr.vmem [resolvable:$true] %s34_s28 }
   0x6   :  { %s2559_s10 = smov 16   ;;  %s2560_s11 = smov [#allocation8]  }
   0x7   :  { %40 = dma.hbm_to_vmem [thread:$0]  %s33_s26, 512, %s35_s28, [#allocation6], %s2558_s9, %s2558_s9, %s2559_s10  }
   0x8   :  { %s58_s12 = sshll.u32 %s2560_s11, 4  ;;  %s22_s15 = sshll.u32 %s2666_s0, 4  ;;  %s59_s12 = int_to_ptr.vmem [resolvable:$true] %s58_s12  ;;  %s23_s15 = int_to_ptr.hbm [resolvable:$true] %s22_s15 }
   0x9   :  { %64 = dma.hbm_to_vmem [thread:$0]  %s57_s8, 16384, %s59_s12, [#allocation9], %s2558_s9, %s2558_s9, %s2559_s10  }
   0xa   :  { %s46_s17 = sshll.u32 %s2668_s2, 4  ;;  %s2561_s18 = smov [#allocation2]   ;;  %s47_s17 = int_to_ptr.hbm [resolvable:$true] %s46_s17 }
   0xb   :  { %s24_s19 = sshll.u32 %s2561_s18, 4  ;;  %s2562_s3 = smov [#allocation7]   ;;  %s25_s19 = int_to_ptr.vmem [resolvable:$true] %s24_s19 }
   0xc   :  { %27 = dma.hbm_to_vmem [thread:$0]  %s23_s15, 32, %s25_s19, [#allocation3]  }
   0xd   :  { %s48_s20 = sshll.u32 %s2562_s3, 4  ;;  %s70_s23 = sshll.u32 %s2670_s4, 4  ;;  %s49_s20 = int_to_ptr.vmem [resolvable:$true] %s48_s20  ;;  %s71_s23 = int_to_ptr.hbm [resolvable:$true] %s70_s23 }
   0xe   :  { %51 = dma.hbm_to_vmem [thread:$0]  %s47_s17, 64, %s49_s20, [#allocation6]  }
   0xf   :  { %s80_s25 = sshll.u32 %s2671_s5, 4  ;;  %s2563_s26 = smov [#allocation10]   ;;  %s81_s25 = int_to_ptr.hbm [resolvable:$true] %s80_s25 }
  0x10   :  { %s72_s2 = sshll.u32 %s2563_s26, 4  ;;  %s2564_s27 = smov [#allocation11]   ;;  %s73_s2 = int_to_ptr.vmem [resolvable:$true] %s72_s2 }
  0x11   :  { %75 = dma.hbm_to_vmem [thread:$0]  %s71_s23, 64, %s73_s2, [#allocation9]  }
  0x12   :  { %s82_s28 = sshll.u32 %s2564_s27, 4  ;;  %s2565_s29 = smov 64   ;;  %s83_s28 = int_to_ptr.vmem [resolvable:$true] %s82_s28 }
  0x13   :  { %s2566_s30 = smov 4  }
  0x14   :  { %88 = dma.hbm_to_vmem [thread:$0]  %s81_s25, 4096, %s83_s28, [#allocation12], %s2565_s29, %s2565_s29, %s2566_s30  }
  0x15   :  { %2547 = dma.done.wait [#allocation3], 32  }
  0x16   :  { %2548 = vsyncadd [#allocation3], 4294967264 }
  0x17   :  { %2549 = dma.done.wait [#allocation6], 576  }
  0x18   :  { %2550 = vsyncadd [#allocation6], 4294966720 }
  0x19   :  { %2551 = dma.done.wait [#allocation9], 16448  }
  0x1a   :  { %2552 = vsyncadd [#allocation9], 4294950848 }
  0x1b   :  { %2553 = dma.done.wait [#allocation12], 4096  }
  0x1c   :  { %2554 = vsyncadd [#allocation12], 4294963200  ;;  %vm152_vm0 = vcmask 130048   ;;  %v1545_v0 = vld [vmem:[#allocation5] sm:$0xf]  ;;  %s2567_s8 = smov [#allocation13]  }
  0x1d   :  { %v2205_v1 = vld [vmem:[#allocation5 + $0xc] sm:$0xf0]  ;;  %v2203_v2 = vld [vmem:[#allocation5 + $0x4] sm:$0xf]  ;;  %v1547_v4 = vld [vmem:[#allocation5 + $0x10] sm:$0xf0] }
  0x1e   :  { %v1546_v3 = vor.u32 %v2205_v1, %v1545_v0  ;;  %v1553_v5 = vld [vmem:[#allocation5 + $0x8] sm:$0xf]  ;;  %v2206_v6 = vld [vmem:[#allocation5 + $0x14] sm:$0xf0]  ;;  %v1550_v7 = vor.u32 %v2203_v2, %v1547_v4  ;;  %v2204_v9 = vld [vmem:[#allocation5 + $0xc] sm:$0xf] }
  0x1f   :  { %v1554_v8 = vor.u32 %v2206_v6, %v1553_v5  ;;  %v1555_v10 = vld [vmem:[#allocation5 + $0x18] sm:$0xf0]  ;;  %v1677_v14 = vld [vmem:[#allocation8 + $0xe0] sm:$0xf]  ;;  %v2237_v15 = vld [vmem:[#allocation8 + $0xec] sm:$0xf0] }
  0x20   :  { %v116_v11 = vld [vmem:[#allocation2] sm:$0x3]  ;;  %163 = vmatpush.bf16.msra.mxu0 %v1546_v3  ;;  %v1558_v12 = vor.u32 %v2204_v9, %v1555_v10  ;;  %v1805_v16 = vld [vmem:[#allocation8 + $0x1e0] sm:$0xf]  ;;  %176 = vmatpush.bf16.msra.mxu1 %v1550_v7  ;;  %v1678_v17 = vor.u32 %v2237_v15, %v1677_v14  ;;  %v2269_v18 = vld [vmem:[#allocation8 + $0x1ec] sm:$0xf0] }
  0x21   :  { %v117_v13 = vpack.c.bf16 %v116_v11, %v116_v11  ;;  %189 = vmatpush.bf16.msra.mxu2 %v1554_v8  ;;  %v1661_v19 = vld [vmem:[#allocation8 + $0xc0] sm:$0xf]  ;;  %v2233_v20 = vld [vmem:[#allocation8 + $0xcc] sm:$0xf0]  ;;  %v1806_v21 = vor.u32 %v2269_v18, %v1805_v16  ;;  %s1528_s9 = sshll.u32 %s2567_s8, 4  ;;  %s1530_s12 = sshll.u32 %s2673_s7, 4  ;;  %s1529_s9 = int_to_ptr.vmem [resolvable:$true] %s1528_s9  ;;  %s1531_s12 = int_to_ptr.hbm [resolvable:$true] %s1530_s12 }
  0x22   :  { %202 = vmatpush.bf16.msra.mxu3 %v1558_v12  ;;  %v1789_v22 = vld [vmem:[#allocation8 + $0x1c0] sm:$0xf]  ;;  %v2265_v23 = vld [vmem:[#allocation8 + $0x1cc] sm:$0xf0]  ;;  %v1662_v30 = vor.u32 %v2233_v20, %v1661_v19 }
  0x23   :  { %v1933_v24 = vld [vmem:[#allocation8 + $0x2e0] sm:$0xf]  ;;  %1559 = vmatmul.msk.bf16.vlgmr.msra.gmra.mxu0 %vm152_vm0, %v117_v13  ;;  %v2301_v25 = vld [vmem:[#allocation8 + $0x2ec] sm:$0xf0]  ;;  %1560 = vmatmul.msk.bf16.vlgmr.msra.gmra.mxu1 %vm152_vm0, %v117_v13  ;;  %v1790_v34 = vor.u32 %v2265_v23, %v1789_v22 }
  0x24   :  { %v2061_v26 = vld [vmem:[#allocation8 + $0x3e0] sm:$0xf]  ;;  %v2333_v27 = vld [vmem:[#allocation8 + $0x3ec] sm:$0xf0]  ;;  %1561 = vmatmul.msk.bf16.vlgmr.msra.gmra.mxu2 %vm152_vm0, %v117_v13  ;;  %v1934_v28 = vor.u32 %v2301_v25, %v1933_v24  ;;  %994 = vmatpush.bf16.msrb.mxu0 %v1678_v17 }
  0x25   :  { %v2062_v29 = vor.u32 %v2333_v27, %v2061_v26  ;;  %1562 = vmatmul.msk.bf16.vlgmr.msra.gmra.mxu3 %vm152_vm0, %v117_v13  ;;  %v1645_v31 = vld [vmem:[#allocation8 + $0xa0] sm:$0xf]  ;;  %v2297_v33 = vld [vmem:[#allocation8 + $0x2cc] sm:$0xf0]  ;;  %1007 = vmatpush.bf16.msrb.mxu1 %v1806_v21 }
  0x26   :  { %v1917_v32 = vld [vmem:[#allocation8 + $0x2c0] sm:$0xf]  ;;  %1020 = vmatpush.bf16.msrb.mxu2 %v1934_v28  ;;  %v2229_v35 = vld [vmem:[#allocation8 + $0xac] sm:$0xf0] }
  0x27   :  { %v1918_v36 = vor.u32 %v2297_v33, %v1917_v32  ;;  %v2045_v37 = vld [vmem:[#allocation8 + $0x3c0] sm:$0xf]  ;;  %v2329_v38 = vld [vmem:[#allocation8 + $0x3cc] sm:$0xf0]  ;;  %1033 = vmatpush.bf16.msrb.mxu3 %v2062_v29  ;;  %v1646_v45 = vor.u32 %v2229_v35, %v1645_v31 }
  0x28   :  { %v1773_v39 = vld [vmem:[#allocation8 + $0x1a0] sm:$0xf]  ;;  %v2261_v40 = vld [vmem:[#allocation8 + $0x1ac] sm:$0xf0]  ;;  %v2046_v41 = vor.u32 %v2329_v38, %v2045_v37  ;;  %995 = vmatpush.bf16.msrb.mxu0 %v1662_v30  ;;  %v1679_v38 = vld [vmem:[#allocation8 + $0xf0] sm:$0xf0] }
  0x29   :  { %v1901_v42 = vld [vmem:[#allocation8 + $0x2a0] sm:$0xf]  ;;  %v2293_v43 = vld [vmem:[#allocation8 + $0x2ac] sm:$0xf0]  ;;  %1008 = vmatpush.bf16.msrb.mxu1 %v1790_v34  ;;  %v1774_v47 = vor.u32 %v2261_v40, %v1773_v39  ;;  %v2267_v39 = vld [vmem:[#allocation8 + $0x1e4] sm:$0xf] }
  0x2a   :  { %v2029_v44 = vld [vmem:[#allocation8 + $0x3a0] sm:$0xf]  ;;  %v2325_v46 = vld [vmem:[#allocation8 + $0x3ac] sm:$0xf0]  ;;  %1021 = vmatpush.bf16.msrb.mxu2 %v1918_v36  ;;  %v1902_v51 = vor.u32 %v2293_v43, %v1901_v42  ;;  %v2235_v36 = vld [vmem:[#allocation8 + $0xe4] sm:$0xf] }
  0x2b   :  { %v1629_v48 = vld [vmem:[#allocation8 + $0x80] sm:$0xf]  ;;  %v2225_v49 = vld [vmem:[#allocation8 + $0x8c] sm:$0xf0]  ;;  %1034 = vmatpush.bf16.msrb.mxu3 %v2046_v41  ;;  %v2030_v53 = vor.u32 %v2325_v46, %v2029_v44  ;;  %v1807_v40 = vld [vmem:[#allocation8 + $0x1f0] sm:$0xf0] }
  0x2c   :  { %v1757_v50 = vld [vmem:[#allocation8 + $0x180] sm:$0xf]  ;;  %v2257_v52 = vld [vmem:[#allocation8 + $0x18c] sm:$0xf0]  ;;  %996 = vmatpush.bf16.msrb.mxu0 %v1646_v45  ;;  %v1630_v58 = vor.u32 %v2225_v49, %v1629_v48  ;;  %v1935_v48 = vld [vmem:[#allocation8 + $0x2f0] sm:$0xf0] }
  0x2d   :  { %v1885_v54 = vld [vmem:[#allocation8 + $0x280] sm:$0xf]  ;;  %v2289_v55 = vld [vmem:[#allocation8 + $0x28c] sm:$0xf0]  ;;  %1009 = vmatpush.bf16.msrb.mxu1 %v1774_v47  ;;  %v1758_v59 = vor.u32 %v2257_v52, %v1757_v50  ;;  %v2299_v47 = vld [vmem:[#allocation8 + $0x2e4] sm:$0xf]  ;;  %v1682_v50 = vor.u32 %v2235_v36, %v1679_v38 }
  0x2e   :  { %v2013_v56 = vld [vmem:[#allocation8 + $0x380] sm:$0xf]  ;;  %v2321_v57 = vld [vmem:[#allocation8 + $0x38c] sm:$0xf0]  ;;  %1022 = vmatpush.bf16.msrb.mxu2 %v1902_v51  ;;  %v1886_v63 = vor.u32 %v2289_v55, %v1885_v54  ;;  %v2331_v51 = vld [vmem:[#allocation8 + $0x3e4] sm:$0xf] }
  0x2f   :  { %v1613_v60 = vld [vmem:[#allocation8 + $0x60] sm:$0xf]  ;;  %v2221_v61 = vld [vmem:[#allocation8 + $0x6c] sm:$0xf0]  ;;  %1035 = vmatpush.bf16.msrb.mxu3 %v2030_v53  ;;  %v2014_v1 = vor.u32 %v2321_v57, %v2013_v56  ;;  %v2063_v52 = vld [vmem:[#allocation8 + $0x3f0] sm:$0xf0]  ;;  %v1810_v53 = vor.u32 %v2267_v39, %v1807_v40 }
  0x30   :  { %v1741_v62 = vld [vmem:[#allocation8 + $0x160] sm:$0xf]  ;;  %v2253_v0 = vld [vmem:[#allocation8 + $0x16c] sm:$0xf0]  ;;  %997 = vmatpush.bf16.msrb.mxu0 %v1630_v58  ;;  %v1614_v6 = vor.u32 %v2221_v61, %v1613_v60  ;;  %v2231_v54 = vld [vmem:[#allocation8 + $0xc4] sm:$0xf]  ;;  %v1938_v60 = vor.u32 %v2299_v47, %v1935_v48  ;;  %v2066_v61 = vor.u32 %v2331_v51, %v2063_v52 }
  0x31   :  { %v1869_v2 = vld [vmem:[#allocation8 + $0x260] sm:$0xf]  ;;  %v2285_v3 = vld [vmem:[#allocation8 + $0x26c] sm:$0xf0]  ;;  %1010 = vmatpush.bf16.msrb.mxu1 %v1758_v59  ;;  %v1742_v7 = vor.u32 %v2253_v0, %v1741_v62  ;;  %v1663_v55 = vld [vmem:[#allocation8 + $0xd0] sm:$0xf0] }
  0x32   :  { %v1997_v4 = vld [vmem:[#allocation8 + $0x360] sm:$0xf]  ;;  %v2317_v5 = vld [vmem:[#allocation8 + $0x36c] sm:$0xf0]  ;;  %1023 = vmatpush.bf16.msrb.mxu2 %v1886_v63  ;;  %v1870_v11 = vor.u32 %v2285_v3, %v1869_v2  ;;  %v2263_v57 = vld [vmem:[#allocation8 + $0x1c4] sm:$0xf]  ;;  %v1666_v0 = vor.u32 %v2231_v54, %v1663_v55 }
  0x33   :  { %v1597_v8 = vld [vmem:[#allocation8 + $0x40] sm:$0xf]  ;;  %v2217_v9 = vld [vmem:[#allocation8 + $0x4c] sm:$0xf0]  ;;  %1036 = vmatpush.bf16.msrb.mxu3 %v2014_v1  ;;  %v1998_v13 = vor.u32 %v2317_v5, %v1997_v4  ;;  %v1791_v58 = vld [vmem:[#allocation8 + $0x1d0] sm:$0xf0] }
  0x34   :  { %v1725_v10 = vld [vmem:[#allocation8 + $0x140] sm:$0xf]  ;;  %v2249_v12 = vld [vmem:[#allocation8 + $0x14c] sm:$0xf0]  ;;  %998 = vmatpush.bf16.msrb.mxu0 %v1614_v6  ;;  %v1598_v18 = vor.u32 %v2217_v9, %v1597_v8  ;;  %v2295_v62 = vld [vmem:[#allocation8 + $0x2c4] sm:$0xf]  ;;  %v1794_v3 = vor.u32 %v2263_v57, %v1791_v58 }
  0x35   :  { %v1853_v14 = vld [vmem:[#allocation8 + $0x240] sm:$0xf]  ;;  %v2281_v15 = vld [vmem:[#allocation8 + $0x24c] sm:$0xf0]  ;;  %1011 = vmatpush.bf16.msrb.mxu1 %v1742_v7  ;;  %v1726_v19 = vor.u32 %v2249_v12, %v1725_v10  ;;  %v1919_v63 = vld [vmem:[#allocation8 + $0x2d0] sm:$0xf0] }
  0x36   :  { %v1981_v16 = vld [vmem:[#allocation8 + $0x340] sm:$0xf]  ;;  %v2313_v17 = vld [vmem:[#allocation8 + $0x34c] sm:$0xf0]  ;;  %1024 = vmatpush.bf16.msrb.mxu2 %v1870_v11  ;;  %v1854_v23 = vor.u32 %v2281_v15, %v1853_v14  ;;  %v2327_v1 = vld [vmem:[#allocation8 + $0x3c4] sm:$0xf]  ;;  %v1922_v8 = vor.u32 %v2295_v62, %v1919_v63 }
  0x37   :  { %v1581_v20 = vld [vmem:[#allocation8 + $0x20] sm:$0xf]  ;;  %v2213_v21 = vld [vmem:[#allocation8 + $0x2c] sm:$0xf0]  ;;  %1037 = vmatpush.bf16.msrb.mxu3 %v1998_v13  ;;  %v1982_v25 = vor.u32 %v2313_v17, %v1981_v16  ;;  %v2047_v2 = vld [vmem:[#allocation8 + $0x3d0] sm:$0xf0] }
  0x38   :  { %v1709_v22 = vld [vmem:[#allocation8 + $0x120] sm:$0xf]  ;;  %v2245_v24 = vld [vmem:[#allocation8 + $0x12c] sm:$0xf0]  ;;  %999 = vmatpush.bf16.msrb.mxu0 %v1598_v18  ;;  %v1582_v30 = vor.u32 %v2213_v21, %v1581_v20  ;;  %v2227_v4 = vld [vmem:[#allocation8 + $0xa4] sm:$0xf]  ;;  %v2050_v9 = vor.u32 %v2327_v1, %v2047_v2 }
  0x39   :  { %v1837_v26 = vld [vmem:[#allocation8 + $0x220] sm:$0xf]  ;;  %v2277_v27 = vld [vmem:[#allocation8 + $0x22c] sm:$0xf0]  ;;  %1012 = vmatpush.bf16.msrb.mxu1 %v1726_v19  ;;  %v1710_v33 = vor.u32 %v2245_v24, %v1709_v22  ;;  %v1647_v5 = vld [vmem:[#allocation8 + $0xb0] sm:$0xf0] }
  0x3a   :  { %v1965_v28 = vld [vmem:[#allocation8 + $0x320] sm:$0xf]  ;;  %v2309_v29 = vld [vmem:[#allocation8 + $0x32c] sm:$0xf0]  ;;  %1025 = vmatpush.bf16.msrb.mxu2 %v1854_v23  ;;  %v1838_v37 = vor.u32 %v2277_v27, %v1837_v26  ;;  %v2259_v6 = vld [vmem:[#allocation8 + $0x1a4] sm:$0xf]  ;;  %v1650_v12 = vor.u32 %v2227_v4, %v1647_v5 }
  0x3b   :  { %v1565_v31 = vld [vmem:[#allocation8] sm:$0xf]  ;;  %v2209_v32 = vld [vmem:[#allocation8 + $0xc] sm:$0xf0]  ;;  %1038 = vmatpush.bf16.msrb.mxu3 %v1982_v25  ;;  %v1966_v41 = vor.u32 %v2309_v29, %v1965_v28  ;;  %v1775_v7 = vld [vmem:[#allocation8 + $0x1b0] sm:$0xf0] }
  0x3c   :  { %v1693_v34 = vld [vmem:[#allocation8 + $0x100] sm:$0xf]  ;;  %v2241_v35 = vld [vmem:[#allocation8 + $0x10c] sm:$0xf0]  ;;  %1000 = vmatpush.bf16.msrb.mxu0 %v1582_v30  ;;  %v1566_v45 = vor.u32 %v2209_v32, %v1565_v31  ;;  %v2291_v10 = vld [vmem:[#allocation8 + $0x2a4] sm:$0xf]  ;;  %v1778_v15 = vor.u32 %v2259_v6, %v1775_v7 }
  0x3d   :  { %v1821_v42 = vld [vmem:[#allocation8 + $0x200] sm:$0xf]  ;;  %v2273_v43 = vld [vmem:[#allocation8 + $0x20c] sm:$0xf0]  ;;  %1013 = vmatpush.bf16.msrb.mxu1 %v1710_v33  ;;  %v1694_v49 = vor.u32 %v2241_v35, %v1693_v34  ;;  %v1903_v11 = vld [vmem:[#allocation8 + $0x2b0] sm:$0xf0] }
  0x3e   :  { %v1949_v44 = vld [vmem:[#allocation8 + $0x300] sm:$0xf]  ;;  %v2305_v46 = vld [vmem:[#allocation8 + $0x30c] sm:$0xf0]  ;;  %1026 = vmatpush.bf16.msrb.mxu2 %v1838_v37  ;;  %v1822_v56 = vor.u32 %v2273_v43, %v1821_v42  ;;  %v2323_v13 = vld [vmem:[#allocation8 + $0x3a4] sm:$0xf]  ;;  %v1906_v20 = vor.u32 %v2291_v10, %v1903_v11 }
  0x3f   :  { %1039 = vmatpush.bf16.msrb.mxu3 %v1966_v41  ;;  %v1950_v59 = vor.u32 %v2305_v46, %v1949_v44  ;;  %v2031_v14 = vld [vmem:[#allocation8 + $0x3b0] sm:$0xf0]  ;;  %v2223_v16 = vld [vmem:[#allocation8 + $0x84] sm:$0xf] }
  0x40   :  { %1001 = vmatpush.bf16.msrb.mxu0 %v1566_v45  ;;  %v1631_v17 = vld [vmem:[#allocation8 + $0x90] sm:$0xf0]  ;;  %v2255_v18 = vld [vmem:[#allocation8 + $0x184] sm:$0xf]  ;;  %v2034_v21 = vor.u32 %v2323_v13, %v2031_v14  ;;  %v122_v14 = vld [vmem:[#allocation7] sm:$0xf] }
  0x41   :  { %1014 = vmatpush.bf16.msrb.mxu1 %v1694_v49  ;;  %v1759_v19 = vld [vmem:[#allocation8 + $0x190] sm:$0xf0]  ;;  %v2287_v22 = vld [vmem:[#allocation8 + $0x284] sm:$0xf]  ;;  %v1634_v24 = vor.u32 %v2223_v16, %v1631_v17  ;;  %v125_v16 = vperm.slane %v122_v14, 1 }
  0x42   :  { %1027 = vmatpush.bf16.msrb.mxu2 %v1822_v56  ;;  %v1887_v23 = vld [vmem:[#allocation8 + $0x290] sm:$0xf0]  ;;  %v2319_v25 = vld [vmem:[#allocation8 + $0x384] sm:$0xf]  ;;  %v1762_v27 = vor.u32 %v2255_v18, %v1759_v19 }
  0x43   :  { %1040 = vmatpush.bf16.msrb.mxu3 %v1950_v59  ;;  %v2015_v26 = vld [vmem:[#allocation8 + $0x390] sm:$0xf0]  ;;  %v2219_v28 = vld [vmem:[#allocation8 + $0x64] sm:$0xf]  ;;  %v1890_v32 = vor.u32 %v2287_v22, %v1887_v23  ;;  %v1813_v23 = vld [vmem:[#allocation8 + $0x1e8] sm:$0xf] }
  0x44   :  { %1046 = vmatpush.bf16.msra.mxu0 %v1682_v50  ;;  %v1615_v29 = vld [vmem:[#allocation8 + $0x70] sm:$0xf0]  ;;  %v2251_v30 = vld [vmem:[#allocation8 + $0x164] sm:$0xf]  ;;  %v2018_v33 = vor.u32 %v2319_v25, %v2015_v26 }
  0x45   :  { %1059 = vmatpush.bf16.msra.mxu1 %v1810_v53  ;;  %v1743_v31 = vld [vmem:[#allocation8 + $0x170] sm:$0xf0]  ;;  %v1618_v34 = vor.u32 %v2219_v28, %v1615_v29  ;;  %v2215_v36 = vld [vmem:[#allocation8 + $0x44] sm:$0xf] }
  0x46   :  { %1072 = vmatpush.bf16.msra.mxu2 %v1938_v60  ;;  %v1746_v35 = vor.u32 %v2251_v30, %v1743_v31  ;;  %v1599_v37 = vld [vmem:[#allocation8 + $0x50] sm:$0xf0]  ;;  %v2247_v38 = vld [vmem:[#allocation8 + $0x144] sm:$0xf]  ;;  %v127_v30 = vperm.slane %v122_v14, 3 }
  0x47   :  { %1085 = vmatpush.bf16.msra.mxu3 %v2066_v61  ;;  %v1727_v39 = vld [vmem:[#allocation8 + $0x150] sm:$0xf0]  ;;  %v1602_v40 = vor.u32 %v2215_v36, %v1599_v37  ;;  %v2283_v42 = vld [vmem:[#allocation8 + $0x264] sm:$0xf]  ;;  %v2266_v36 = vld [vmem:[#allocation8 + $0x1d4] sm:$0xf0] }
  0x48   :  { %1047 = vmatpush.bf16.msra.mxu0 %v1666_v0  ;;  %v1730_v41 = vor.u32 %v2247_v38, %v1727_v39  ;;  %v1871_v43 = vld [vmem:[#allocation8 + $0x270] sm:$0xf0]  ;;  %v2315_v44 = vld [vmem:[#allocation8 + $0x364] sm:$0xf] }
  0x49   :  { %1060 = vmatpush.bf16.msra.mxu1 %v1794_v3  ;;  %v1874_v45 = vor.u32 %v2283_v42, %v1871_v43  ;;  %v1999_v46 = vld [vmem:[#allocation8 + $0x370] sm:$0xf0]  ;;  %v2211_v48 = vld [vmem:[#allocation8 + $0x24] sm:$0xf]  ;;  %v1941_v42 = vld [vmem:[#allocation8 + $0x2e8] sm:$0xf] }
  0x4a   :  { %1073 = vmatpush.bf16.msra.mxu2 %v1922_v8  ;;  %v2002_v47 = vor.u32 %v2315_v44, %v1999_v46  ;;  %v1583_v49 = vld [vmem:[#allocation8 + $0x30] sm:$0xf0]  ;;  %v2243_v51 = vld [vmem:[#allocation8 + $0x124] sm:$0xf]  ;;  %v2302_v43 = vld [vmem:[#allocation8 + $0x2f4] sm:$0xf0] }
  0x4b   :  { %1086 = vmatpush.bf16.msra.mxu3 %v2050_v9  ;;  %v1586_v50 = vor.u32 %v2211_v48, %v1583_v49  ;;  %v1711_v52 = vld [vmem:[#allocation8 + $0x130] sm:$0xf0]  ;;  %v2279_v54 = vld [vmem:[#allocation8 + $0x244] sm:$0xf]  ;;  %v2069_v44 = vld [vmem:[#allocation8 + $0x3e8] sm:$0xf] }
  0x4c   :  { %1048 = vmatpush.bf16.msra.mxu0 %v1650_v12  ;;  %v1714_v53 = vor.u32 %v2243_v51, %v1711_v52  ;;  %v1855_v55 = vld [vmem:[#allocation8 + $0x250] sm:$0xf0]  ;;  %v2311_v56 = vld [vmem:[#allocation8 + $0x344] sm:$0xf]  ;;  %v2334_v48 = vld [vmem:[#allocation8 + $0x3f4] sm:$0xf0] }
  0x4d   :  { %1061 = vmatpush.bf16.msra.mxu1 %v1778_v15  ;;  %v1858_v57 = vor.u32 %v2279_v54, %v1855_v55  ;;  %v1983_v58 = vld [vmem:[#allocation8 + $0x350] sm:$0xf0]  ;;  %v2207_v60 = vld [vmem:[#allocation8 + $0x4] sm:$0xf]  ;;  %v124_v15 = vperm.slane %v122_v14, 0  ;;  %v1942_v55 = vor.u32 %v2302_v43, %v1941_v42 }
  0x4e   :  { %1074 = vmatpush.bf16.msra.mxu2 %v1906_v20  ;;  %v1986_v59 = vor.u32 %v2311_v56, %v1983_v58  ;;  %v1567_v61 = vld [vmem:[#allocation8 + $0x10] sm:$0xf0]  ;;  %v2239_v62 = vld [vmem:[#allocation8 + $0x104] sm:$0xf]  ;;  %v1685_v20 = vld [vmem:[#allocation8 + $0xe8] sm:$0xf] }
  0x4f   :  { %1087 = vmatpush.bf16.msra.mxu3 %v2034_v21  ;;  %v1570_v63 = vor.u32 %v2207_v60, %v1567_v61  ;;  %v1695_v0 = vld [vmem:[#allocation8 + $0x110] sm:$0xf0]  ;;  %v2275_v2 = vld [vmem:[#allocation8 + $0x224] sm:$0xf]  ;;  %v2238_v21 = vld [vmem:[#allocation8 + $0xf4] sm:$0xf0] }
  0x50   :  { %1049 = vmatpush.bf16.msra.mxu0 %v1634_v24  ;;  %v1698_v1 = vor.u32 %v2239_v62, %v1695_v0  ;;  %v1839_v3 = vld [vmem:[#allocation8 + $0x230] sm:$0xf0]  ;;  %v2307_v5 = vld [vmem:[#allocation8 + $0x324] sm:$0xf]  ;;  %v2270_v24 = vld [vmem:[#allocation8 + $0x1f4] sm:$0xf0]  ;;  %v1686_v28 = vor.u32 %v2238_v21, %v1685_v20 }
  0x51   :  { %1062 = vmatpush.bf16.msra.mxu1 %v1762_v27  ;;  %v1842_v4 = vor.u32 %v2275_v2, %v1839_v3  ;;  %v1967_v6 = vld [vmem:[#allocation8 + $0x330] sm:$0xf0]  ;;  %v2271_v8 = vld [vmem:[#allocation8 + $0x204] sm:$0xf]  ;;  %v126_v27 = vperm.slane %v122_v14, 2  ;;  %v1814_v31 = vor.u32 %v2270_v24, %v1813_v23 }
  0x52   :  { %1075 = vmatpush.bf16.msra.mxu2 %v1890_v32  ;;  %v1970_v7 = vor.u32 %v2307_v5, %v1967_v6  ;;  %v1823_v9 = vld [vmem:[#allocation8 + $0x210] sm:$0xf0]  ;;  %v2303_v11 = vld [vmem:[#allocation8 + $0x304] sm:$0xf]  ;;  %v1669_v32 = vld [vmem:[#allocation8 + $0xc8] sm:$0xf] }
  0x53   :  { %1088 = vmatpush.bf16.msra.mxu3 %v2018_v33  ;;  %v1826_v10 = vor.u32 %v2271_v8, %v1823_v9  ;;  %v1951_v12 = vld [vmem:[#allocation8 + $0x310] sm:$0xf0]  ;;  %v2234_v33 = vld [vmem:[#allocation8 + $0xd4] sm:$0xf0]  ;;  %v1653_v49 = vld [vmem:[#allocation8 + $0xa8] sm:$0xf] }
  0x54   :  { %1050 = vmatpush.bf16.msra.mxu0 %v1618_v34  ;;  %v1954_v13 = vor.u32 %v2303_v11, %v1951_v12  ;;  %v1781_v52 = vld [vmem:[#allocation8 + $0x1a8] sm:$0xf]  ;;  %v2298_v60 = vld [vmem:[#allocation8 + $0x2d4] sm:$0xf0] }
  0x55   :  { %1063 = vmatpush.bf16.msra.mxu1 %v1746_v35  ;;  %v1797_v35 = vld [vmem:[#allocation8 + $0x1c8] sm:$0xf]  ;;  %v2330_v0 = vld [vmem:[#allocation8 + $0x3d4] sm:$0xf0] }
  0x56   :  { %1076 = vmatpush.bf16.msra.mxu2 %v1874_v45  ;;  %v2053_v61 = vld [vmem:[#allocation8 + $0x3c8] sm:$0xf]  ;;  %v2226_v2 = vld [vmem:[#allocation8 + $0x94] sm:$0xf0] }
  0x57   :  { %1089 = vmatpush.bf16.msra.mxu3 %v2002_v47  ;;  %v1798_v47 = vor.u32 %v2266_v36, %v1797_v35  ;;  %v1765_v3 = vld [vmem:[#allocation8 + $0x188] sm:$0xf]  ;;  %v2054_v8 = vor.u32 %v2330_v0, %v2053_v61  ;;  %v2294_v11 = vld [vmem:[#allocation8 + $0x2b4] sm:$0xf0]  ;;  %v2268_v61 = vld [vmem:[#allocation8 + $0x1ec] sm:$0xf] }
  0x58   :  { %1051 = vmatpush.bf16.msra.mxu0 %v1602_v40  ;;  %v2326_v14 = vld [vmem:[#allocation8 + $0x3b4] sm:$0xf0]  ;;  %v1893_v21 = vld [vmem:[#allocation8 + $0x288] sm:$0xf] }
  0x59   :  { %1064 = vmatpush.bf16.msra.mxu1 %v1730_v41  ;;  %v1670_v41 = vor.u32 %v2234_v33, %v1669_v32  ;;  %v1877_v35 = vld [vmem:[#allocation8 + $0x268] sm:$0xf]  ;;  %v2286_v36 = vld [vmem:[#allocation8 + $0x274] sm:$0xf0] }
  0x5a   :  { %1077 = vmatpush.bf16.msra.mxu2 %v1858_v57  ;;  %v2070_v57 = vor.u32 %v2334_v48, %v2069_v44  ;;  %v2214_v42 = vld [vmem:[#allocation8 + $0x34] sm:$0xf0]  ;;  %v1717_v43 = vld [vmem:[#allocation8 + $0x128] sm:$0xf] }
  0x5b   :  { %1090 = vmatpush.bf16.msra.mxu3 %v1986_v59  ;;  %v1925_v59 = vld [vmem:[#allocation8 + $0x2c8] sm:$0xf]  ;;  %v2246_v44 = vld [vmem:[#allocation8 + $0x134] sm:$0xf0] }
  0x5c   :  { %1052 = vmatpush.bf16.msra.mxu0 %v1586_v50  ;;  %v2230_v50 = vld [vmem:[#allocation8 + $0xb4] sm:$0xf0]  ;;  %v1926_v6 = vor.u32 %v2298_v60, %v1925_v59  ;;  %v1687_v60 = vld [vmem:[#allocation8 + $0xf8] sm:$0xf0] }
  0x5d   :  { %1065 = vmatpush.bf16.msra.mxu1 %v1714_v53  ;;  %v2262_v53 = vld [vmem:[#allocation8 + $0x1b4] sm:$0xf0]  ;;  %v1654_v58 = vor.u32 %v2230_v50, %v1653_v49  ;;  %v1989_v49 = vld [vmem:[#allocation8 + $0x348] sm:$0xf] }
  0x5e   :  { %1078 = vmatpush.bf16.msra.mxu2 %v1842_v4  ;;  %v2258_v4 = vld [vmem:[#allocation8 + $0x194] sm:$0xf0] }
  0x5f   :  { %1091 = vmatpush.bf16.msra.mxu3 %v1970_v7  ;;  %v1766_v12 = vor.u32 %v2258_v4, %v1765_v3  ;;  %v2282_v48 = vld [vmem:[#allocation8 + $0x254] sm:$0xf0] }
  0x60   :  { %1053 = vmatpush.bf16.msra.mxu0 %v1570_v63  ;;  %v1782_v63 = vor.u32 %v2262_v53, %v1781_v52  ;;  %v2314_v52 = vld [vmem:[#allocation8 + $0x354] sm:$0xf0]  ;;  %v1573_v53 = vld [vmem:[#allocation8 + $0x8] sm:$0xf] }
  0x61   :  { %1066 = vmatpush.bf16.msra.mxu1 %v1698_v1  ;;  %v1637_v1 = vld [vmem:[#allocation8 + $0x88] sm:$0xf]  ;;  %v1990_v0 = vor.u32 %v2314_v52, %v1989_v49  ;;  %v2039_v52 = vld [vmem:[#allocation8 + $0x3b8] sm:$0xf0] }
  0x62   :  { %1079 = vmatpush.bf16.msra.mxu2 %v1826_v10  ;;  %v1638_v9 = vor.u32 %v2226_v2, %v1637_v1  ;;  %v1909_v10 = vld [vmem:[#allocation8 + $0x2a8] sm:$0xf]  ;;  %v2278_v2 = vld [vmem:[#allocation8 + $0x234] sm:$0xf0] }
  0x63   :  { %1092 = vmatpush.bf16.msra.mxu3 %v1954_v13  ;;  %v2037_v13 = vld [vmem:[#allocation8 + $0x3a8] sm:$0xf] }
  0x64   :  { %v2038_v20 = vor.u32 %v2326_v14, %v2037_v13  ;;  %v1845_v1 = vld [vmem:[#allocation8 + $0x228] sm:$0xf]  ;;  %v1799_v13 = vld [vmem:[#allocation8 + $0x1d8] sm:$0xf0] }
  0xa0   :  { %v165_v17 = vpop.f32.mrf.mxu0  ;;  %v178_v19 = vpop.f32.mrf.mxu1 }
  0xa1   :  { %v166_v18 = vadd.f32 %v165_v17, %v124_v15  ;;  %v179_v22 = vadd.f32 %v178_v19, %v125_v16  ;;  %v1621_v15 = vld [vmem:[#allocation8 + $0x68] sm:$0xf]  ;;  %v2222_v16 = vld [vmem:[#allocation8 + $0x74] sm:$0xf0]  ;;  %v1910_v19 = vor.u32 %v2294_v11, %v1909_v10  ;;  %v1846_v10 = vor.u32 %v2278_v2, %v1845_v1  ;;  %v1671_v11 = vld [vmem:[#allocation8 + $0xd8] sm:$0xf0] }
  0xa2   :  { %v1749_v17 = vld [vmem:[#allocation8 + $0x168] sm:$0xf]  ;;  %v1622_v23 = vor.u32 %v2222_v16, %v1621_v15  ;;  %v2274_v16 = vld [vmem:[#allocation8 + $0x214] sm:$0xf0]  ;;  %v2320_v1 = vld [vmem:[#allocation8 + $0x38c] sm:$0xf] }
  0xa3   :  { %v208_v25 = vmax.f32 %v166_v18, 0.0  ;;  %v209_v26 = vmax.f32 %v179_v22, 0.0  ;;  %v2254_v18 = vld [vmem:[#allocation8 + $0x174] sm:$0xf0]  ;;  %v1829_v15 = vld [vmem:[#allocation8 + $0x208] sm:$0xf] }
  0xa4   :  { %v2290_v22 = vld [vmem:[#allocation8 + $0x294] sm:$0xf0]  ;;  %v1750_v24 = vor.u32 %v2254_v18, %v1749_v17  ;;  %v1957_v17 = vld [vmem:[#allocation8 + $0x308] sm:$0xf]  ;;  %v2023_v2 = vld [vmem:[#allocation8 + $0x398] sm:$0xf0] }
  0xa5   :  { %v2630_v29 = vpack.c.bf16 %v208_v25, %v208_v25  ;;  %v2632_v34 = vpack.c.bf16 %v209_v26, %v209_v26  ;;  %v2021_v25 = vld [vmem:[#allocation8 + $0x388] sm:$0xf]  ;;  %v2322_v26 = vld [vmem:[#allocation8 + $0x394] sm:$0xf0]  ;;  %v1894_v32 = vor.u32 %v2290_v22, %v1893_v21 }
  0xa6   :  { %v2022_v33 = vor.u32 %v2322_v26, %v2021_v25  ;;  %v2306_v18 = vld [vmem:[#allocation8 + $0x314] sm:$0xf0]  ;;  %v2228_v25 = vld [vmem:[#allocation8 + $0xac] sm:$0xf]  ;;  %v1830_v26 = vor.u32 %v2274_v16, %v1829_v15  ;;  %v1591_v16 = vld [vmem:[#allocation8 + $0x38] sm:$0xf0] }
  0xa7   :  { %v191_v37 = vpop.f32.mrf.mxu2  ;;  %1002 = vmatmul.bf16.vlgmr.msrb.gmra.mxu0 %v2630_v29  ;;  %1015 = vmatmul.bf16.vlgmr.msrb.gmra.mxu1 %v2632_v34  ;;  %v2212_v15 = vld [vmem:[#allocation8 + $0x2c] sm:$0xf] }
  0xa8   :  { %v192_v38 = vadd.f32 %v191_v37, %v126_v27  ;;  %v204_v39 = vpop.f32.mrf.mxu3  ;;  %1098 = vmatpush.bf16.msrb.mxu0 %v1686_v28  ;;  %v167_v40 = vpop.f32.mrf.mxu0  ;;  %1111 = vmatpush.bf16.msrb.mxu1 %v1814_v31  ;;  %v1605_v27 = vld [vmem:[#allocation8 + $0x48] sm:$0xf]  ;;  %v2218_v28 = vld [vmem:[#allocation8 + $0x54] sm:$0xf0] }
  0xa9   :  { %v205_v45 = vadd.f32 %v204_v39, %v127_v30  ;;  %v180_v46 = vpop.f32.mrf.mxu1  ;;  %v1733_v30 = vld [vmem:[#allocation8 + $0x148] sm:$0xf]  ;;  %v2250_v31 = vld [vmem:[#allocation8 + $0x154] sm:$0xf0]  ;;  %v1606_v37 = vor.u32 %v2218_v28, %v1605_v27  ;;  %v1655_v27 = vld [vmem:[#allocation8 + $0xb8] sm:$0xf0] }
  0xaa   :  { %v210_v51 = vmax.f32 %v192_v38, 0.0  ;;  %v1734_v38 = vor.u32 %v2250_v31, %v1733_v30  ;;  %v2005_v39 = vld [vmem:[#allocation8 + $0x368] sm:$0xf]  ;;  %v2318_v40 = vld [vmem:[#allocation8 + $0x374] sm:$0xf0]  ;;  %v1958_v31 = vor.u32 %v2306_v18, %v1957_v17 }
  0xab   :  { %v211_v54 = vmax.f32 %v205_v45, 0.0  ;;  %v1878_v45 = vor.u32 %v2286_v36, %v1877_v35  ;;  %v2006_v46 = vor.u32 %v2318_v40, %v2005_v39  ;;  %v2260_v28 = vld [vmem:[#allocation8 + $0x1ac] sm:$0xf]  ;;  %v1783_v30 = vld [vmem:[#allocation8 + $0x1b8] sm:$0xf0] }
  0xac   :  { %v2636_v56 = vpack.c.bf16 %v210_v51, %v210_v51  ;;  %1099 = vmatpush.bf16.msrb.mxu0 %v1670_v41  ;;  %1112 = vmatpush.bf16.msrb.mxu1 %v1798_v47  ;;  %v1589_v41 = vld [vmem:[#allocation8 + $0x28] sm:$0xf]  ;;  %v1718_v51 = vor.u32 %v2246_v44, %v1717_v43  ;;  %v2296_v35 = vld [vmem:[#allocation8 + $0x2cc] sm:$0xf]  ;;  %v1927_v36 = vld [vmem:[#allocation8 + $0x2d8] sm:$0xf0] }
  0xad   :  { %v2638_v62 = vpack.c.bf16 %v211_v54, %v211_v54  ;;  %v1861_v47 = vld [vmem:[#allocation8 + $0x248] sm:$0xf]  ;;  %v1590_v50 = vor.u32 %v2214_v42, %v1589_v41  ;;  %v2210_v54 = vld [vmem:[#allocation8 + $0x14] sm:$0xf0]  ;;  %v2328_v39 = vld [vmem:[#allocation8 + $0x3cc] sm:$0xf] }
  0xae   :  { %1028 = vmatmul.bf16.vlgmr.msrb.gmra.mxu2 %v2636_v56  ;;  %v1862_v59 = vor.u32 %v2282_v48, %v1861_v47  ;;  %v1574_v3 = vor.u32 %v2210_v54, %v1573_v53  ;;  %v2055_v40 = vld [vmem:[#allocation8 + $0x3d8] sm:$0xf0]  ;;  %v2224_v41 = vld [vmem:[#allocation8 + $0x8c] sm:$0xf] }
  0xaf   :  { %1041 = vmatmul.bf16.vlgmr.msrb.gmra.mxu3 %v2638_v62  ;;  %1124 = vmatpush.bf16.msrb.mxu2 %v1942_v55  ;;  %v193_v5 = vpop.f32.mrf.mxu2  ;;  %v1701_v55 = vld [vmem:[#allocation8 + $0x108] sm:$0xf]  ;;  %v1639_v42 = vld [vmem:[#allocation8 + $0x98] sm:$0xf0]  ;;  %v2256_v43 = vld [vmem:[#allocation8 + $0x18c] sm:$0xf] }
  0xb0   :  { %1137 = vmatpush.bf16.msrb.mxu3 %v2070_v57  ;;  %v206_v7 = vpop.f32.mrf.mxu3  ;;  %1100 = vmatpush.bf16.msrb.mxu0 %v1654_v58  ;;  %v2242_v57 = vld [vmem:[#allocation8 + $0x114] sm:$0xf0]  ;;  %v2236_v58 = vld [vmem:[#allocation8 + $0xec] sm:$0xf]  ;;  %v1973_v5 = vld [vmem:[#allocation8 + $0x328] sm:$0xf]  ;;  %v1642_v49 = vor.u32 %v2224_v41, %v1639_v42 }
  0xb1   :  { %1113 = vmatpush.bf16.msrb.mxu1 %v1782_v63  ;;  %v1815_v63 = vld [vmem:[#allocation8 + $0x1f8] sm:$0xf0]  ;;  %v1702_v4 = vor.u32 %v2242_v57, %v1701_v55  ;;  %v1690_v7 = vor.u32 %v2236_v58, %v1687_v60  ;;  %v2292_v47 = vld [vmem:[#allocation8 + $0x2ac] sm:$0xf] }
  0xb2   :  { %v1767_v44 = vld [vmem:[#allocation8 + $0x198] sm:$0xf0]  ;;  %v2220_v53 = vld [vmem:[#allocation8 + $0x6c] sm:$0xf] }
  0xb3   :  { %1125 = vmatpush.bf16.msrb.mxu2 %v1926_v6  ;;  %v2310_v6 = vld [vmem:[#allocation8 + $0x334] sm:$0xf0]  ;;  %v1911_v48 = vld [vmem:[#allocation8 + $0x2b8] sm:$0xf0]  ;;  %v2252_v55 = vld [vmem:[#allocation8 + $0x16c] sm:$0xf] }
  0xb4   :  { %1138 = vmatpush.bf16.msrb.mxu3 %v2054_v8  ;;  %1101 = vmatpush.bf16.msrb.mxu0 %v1638_v9  ;;  %v1818_v8 = vor.u32 %v2268_v61, %v1815_v63  ;;  %v2232_v9 = vld [vmem:[#allocation8 + $0xcc] sm:$0xf]  ;;  %v1974_v14 = vor.u32 %v2310_v6, %v1973_v5  ;;  %v1623_v54 = vld [vmem:[#allocation8 + $0x78] sm:$0xf0]  ;;  %v1914_v58 = vor.u32 %v2292_v47, %v1911_v48  ;;  %v2341_v48 = vld [vmem:[#allocation11 + $0x30] sm:$0xff] }
  0xb5   :  { %1114 = vmatpush.bf16.msrb.mxu1 %v1766_v12  ;;  %v2264_v12 = vld [vmem:[#allocation8 + $0x1cc] sm:$0xf]  ;;  %v1674_v21 = vor.u32 %v2232_v9, %v1671_v11  ;;  %v1751_v57 = vld [vmem:[#allocation8 + $0x178] sm:$0xf0]  ;;  %v1626_v63 = vor.u32 %v2220_v53, %v1623_v54 }
  0xb6   :  { %v1802_v22 = vor.u32 %v2264_v12, %v1799_v13  ;;  %v2288_v60 = vld [vmem:[#allocation8 + $0x28c] sm:$0xf]  ;;  %v1895_v61 = vld [vmem:[#allocation8 + $0x298] sm:$0xf0] }
  0xb7   :  { %1126 = vmatpush.bf16.msrb.mxu2 %v1910_v19  ;;  %1054 = vmatmul.bf16.vlgmr.msra.gmra.mxu0 %v2630_v29  ;;  %v2300_v19 = vld [vmem:[#allocation8 + $0x2ec] sm:$0xf]  ;;  %v1735_v6 = vld [vmem:[#allocation8 + $0x158] sm:$0xf0] }
  0xb8   :  { %1139 = vmatpush.bf16.msrb.mxu3 %v2038_v20  ;;  %1067 = vmatmul.bf16.vlgmr.msra.gmra.mxu1 %v2632_v34  ;;  %v1943_v20 = vld [vmem:[#allocation8 + $0x2f8] sm:$0xf0]  ;;  %v2248_v5 = vld [vmem:[#allocation8 + $0x14c] sm:$0xf] }
  0xb9   :  { %1102 = vmatpush.bf16.msrb.mxu0 %v1622_v23  ;;  %1115 = vmatpush.bf16.msrb.mxu1 %v1750_v24  ;;  %v2332_v23 = vld [vmem:[#allocation8 + $0x3ec] sm:$0xf]  ;;  %v2071_v24 = vld [vmem:[#allocation8 + $0x3f8] sm:$0xf0]  ;;  %v1738_v12 = vor.u32 %v2248_v5, %v1735_v6  ;;  %v2343_v5 = vld [vmem:[#allocation11 + $0x40] sm:$0xff] }
  0xba   :  { %v2284_v9 = vld [vmem:[#allocation8 + $0x26c] sm:$0xf]  ;;  %v1719_v18 = vld [vmem:[#allocation8 + $0x138] sm:$0xf0]  ;;  %v2355_v6 = vld [vmem:[#allocation11 + $0xa0] sm:$0xff] }
  0xbb   :  { %1127 = vmatpush.bf16.msrb.mxu2 %v1894_v32  ;;  %v1946_v32 = vor.u32 %v2300_v19, %v1943_v20  ;;  %v2316_v13 = vld [vmem:[#allocation8 + $0x36c] sm:$0xf]  ;;  %v2342_v41 = vld [vmem:[#allocation11 + $0x38] sm:$0xff] }
  0xbc   :  { %1140 = vmatpush.bf16.msrb.mxu3 %v2022_v33  ;;  %v2074_v33 = vor.u32 %v2332_v23, %v2071_v24  ;;  %v2244_v17 = vld [vmem:[#allocation8 + $0x12c] sm:$0xf]  ;;  %v1594_v23 = vor.u32 %v2212_v15, %v1591_v16  ;;  %v1959_v47 = vld [vmem:[#allocation8 + $0x318] sm:$0xf0] }
  0xbd   :  { %1103 = vmatpush.bf16.msrb.mxu0 %v1606_v37  ;;  %1116 = vmatpush.bf16.msrb.mxu1 %v1734_v38  ;;  %v1658_v37 = vor.u32 %v2228_v25, %v1655_v27  ;;  %v1786_v38 = vor.u32 %v2260_v28, %v1783_v30  ;;  %v1722_v24 = vor.u32 %v2244_v17, %v1719_v18  ;;  %v2312_v25 = vld [vmem:[#allocation8 + $0x34c] sm:$0xf]  ;;  %v1575_v28 = vld [vmem:[#allocation8 + $0x18] sm:$0xf0] }
  0xbe   :  { %1080 = vmatmul.bf16.vlgmr.msra.gmra.mxu2 %v2636_v56  ;;  %v2208_v27 = vld [vmem:[#allocation8 + $0xc] sm:$0xf]  ;;  %v2350_v53 = vld [vmem:[#allocation11 + $0x78] sm:$0xff] }
  0xbf   :  { %1093 = vmatmul.bf16.vlgmr.msra.gmra.mxu3 %v2638_v62  ;;  %1128 = vmatpush.bf16.msrb.mxu2 %v1878_v45  ;;  %v1930_v45 = vor.u32 %v2296_v35, %v1927_v36  ;;  %v2240_v30 = vld [vmem:[#allocation8 + $0x10c] sm:$0xf]  ;;  %v1847_v36 = vld [vmem:[#allocation8 + $0x238] sm:$0xf0] }
  0xc0   :  { %1141 = vmatpush.bf16.msrb.mxu3 %v2006_v46  ;;  %v2058_v46 = vor.u32 %v2328_v39, %v2055_v40  ;;  %v2276_v35 = vld [vmem:[#allocation8 + $0x22c] sm:$0xf]  ;;  %v1975_v40 = vld [vmem:[#allocation8 + $0x338] sm:$0xf0] }
  0xc1   :  { %1104 = vmatpush.bf16.msrb.mxu0 %v1590_v50  ;;  %1117 = vmatpush.bf16.msrb.mxu1 %v1718_v51  ;;  %v1770_v50 = vor.u32 %v2256_v43, %v1767_v44  ;;  %v2324_v51 = vld [vmem:[#allocation8 + $0x3ac] sm:$0xf]  ;;  %v1850_v42 = vor.u32 %v2276_v35, %v1847_v36  ;;  %v2338_v54 = vld [vmem:[#allocation11 + $0x18] sm:$0xff] }
  0xc2   :  { %v2308_v39 = vld [vmem:[#allocation8 + $0x32c] sm:$0xf] }
  0xc3   :  { %1129 = vmatpush.bf16.msrb.mxu2 %v1862_v59  ;;  %v2042_v59 = vor.u32 %v2324_v51, %v2039_v52  ;;  %v1978_v43 = vor.u32 %v2308_v39, %v1975_v40  ;;  %v2272_v44 = vld [vmem:[#allocation8 + $0x20c] sm:$0xf]  ;;  %v2339_v52 = vld [vmem:[#allocation11 + $0x20] sm:$0xff] }
  0xc4   :  { %1142 = vmatpush.bf16.msrb.mxu3 %v1990_v0  ;;  %v1754_v0 = vor.u32 %v2252_v55, %v1751_v57  ;;  %v2340_v51 = vld [vmem:[#allocation11 + $0x28] sm:$0xff]  ;;  %v2337_v55 = vld [vmem:[#allocation11 + $0x10] sm:$0xff] }
  0xc5   :  { %1105 = vmatpush.bf16.msrb.mxu0 %v1574_v3  ;;  %1118 = vmatpush.bf16.msrb.mxu1 %v1702_v4  ;;  %v2216_v3 = vld [vmem:[#allocation8 + $0x4c] sm:$0xf]  ;;  %v1607_v4 = vld [vmem:[#allocation8 + $0x58] sm:$0xf0] }
  0xc6   :  { %v1610_v11 = vor.u32 %v2216_v3, %v1607_v4  ;;  %v2348_v57 = vld [vmem:[#allocation11 + $0x68] sm:$0xff] }
  0xc7   :  { %1130 = vmatpush.bf16.msrb.mxu2 %v1846_v10  ;;  %v1879_v10 = vld [vmem:[#allocation8 + $0x278] sm:$0xf0]  ;;  %v2352_v16 = vld [vmem:[#allocation11 + $0x88] sm:$0xff] }
  0xc8   :  { %1143 = vmatpush.bf16.msrb.mxu3 %v1974_v14  ;;  %1106 = vmatmul.bf16.vlgmr.msrb.gmra.mxu0 %v2630_v29  ;;  %v2007_v14 = vld [vmem:[#allocation8 + $0x378] sm:$0xf0]  ;;  %v1882_v19 = vor.u32 %v2284_v9, %v1879_v10 }
  0xc9   :  { %1150 = vmatpush.bf16.msra.mxu0 %v1690_v7  ;;  %1163 = vmatpush.bf16.msra.mxu1 %v1818_v8  ;;  %v1898_v7 = vor.u32 %v2288_v60, %v1895_v61  ;;  %v2026_v8 = vor.u32 %v2320_v1, %v2023_v2  ;;  %v2010_v20 = vor.u32 %v2316_v13, %v2007_v14  ;;  %v2345_v60 = vld [vmem:[#allocation11 + $0x50] sm:$0xff]  ;;  %v2356_v1 = vld [vmem:[#allocation11 + $0xa8] sm:$0xff] }
  0xca   :  { %1119 = vmatmul.bf16.vlgmr.msrb.gmra.mxu1 %v2632_v34  ;;  %v2357_v61 = vld [vmem:[#allocation11 + $0xb0] sm:$0xff] }
  0xcb   :  { %1131 = vmatpush.bf16.msrb.mxu2 %v1830_v26  ;;  %v1991_v26 = vld [vmem:[#allocation8 + $0x358] sm:$0xf0] }
  0xcc   :  { %1144 = vmatpush.bf16.msrb.mxu3 %v1958_v31  ;;  %v1703_v31 = vld [vmem:[#allocation8 + $0x118] sm:$0xf0] }
  0xcd   :  { %1151 = vmatpush.bf16.msra.mxu0 %v1674_v21  ;;  %1164 = vmatpush.bf16.msra.mxu1 %v1802_v22  ;;  %v2280_v21 = vld [vmem:[#allocation8 + $0x24c] sm:$0xf]  ;;  %v1863_v22 = vld [vmem:[#allocation8 + $0x258] sm:$0xf0] }
  0xce   :  { %1132 = vmatmul.bf16.vlgmr.msrb.gmra.mxu2 %v2636_v56 }
  0xcf   :  { %1176 = vmatpush.bf16.msra.mxu2 %v1946_v32  ;;  %1145 = vmatmul.bf16.vlgmr.msrb.gmra.mxu3 %v2638_v62  ;;  %v1866_v32 = vor.u32 %v2280_v21, %v1863_v22  ;;  %v2351_v21 = vld [vmem:[#allocation11 + $0x80] sm:$0xff]  ;;  %v2366_v22 = vld [vmem:[#allocation11 + $0xf8] sm:$0xff] }
  0xd0   :  { %1189 = vmatpush.bf16.msra.mxu3 %v2074_v33  ;;  %v1994_v33 = vor.u32 %v2312_v25, %v1991_v26 }
  0xd1   :  { %1152 = vmatpush.bf16.msra.mxu0 %v1658_v37  ;;  %1165 = vmatpush.bf16.msra.mxu1 %v1786_v38  ;;  %v1578_v37 = vor.u32 %v2208_v27, %v1575_v28  ;;  %v1706_v38 = vor.u32 %v2240_v30, %v1703_v31  ;;  %v2365_v27 = vld [vmem:[#allocation11 + $0xf0] sm:$0xff] }
  0xd3   :  { %1177 = vmatpush.bf16.msra.mxu2 %v1930_v45  ;;  %v1831_v45 = vld [vmem:[#allocation8 + $0x218] sm:$0xf0] }
  0xd4   :  { %1190 = vmatpush.bf16.msra.mxu3 %v2058_v46  ;;  %v2304_v46 = vld [vmem:[#allocation8 + $0x30c] sm:$0xf] }
  0xd5   :  { %1153 = vmatpush.bf16.msra.mxu0 %v1642_v49  ;;  %1166 = vmatpush.bf16.msra.mxu1 %v1770_v50  ;;  %v1834_v49 = vor.u32 %v2272_v44, %v1831_v45  ;;  %v1962_v50 = vor.u32 %v2304_v46, %v1959_v47 }
  0xd7   :  { %1178 = vmatpush.bf16.msra.mxu2 %v1914_v58  ;;  %v2335_v58 = vld [vmem:[#allocation11] sm:$0xff] }
  0xd8   :  { %1191 = vmatpush.bf16.msra.mxu3 %v2042_v59  ;;  %v2347_v59 = vld [vmem:[#allocation11 + $0x60] sm:$0xff] }
  0xd9   :  { %1154 = vmatpush.bf16.msra.mxu0 %v1626_v63  ;;  %1167 = vmatpush.bf16.msra.mxu1 %v1754_v0  ;;  %v2654_v63 = vld [vmem:[#allocation10] sm:$0xf]  ;;  %v2344_v0 = vld [vmem:[#allocation11 + $0x48] sm:$0xff] }
  0xda   :  { %v346_v4 = vperm.slane %v2654_v63, 0  ;;  %v348_v45 = vperm.slane %v2654_v63, 2 }
  0xdb   :  { %1179 = vmatpush.bf16.msra.mxu2 %v1898_v7 }
  0xdc   :  { %1192 = vmatpush.bf16.msra.mxu3 %v2026_v8  ;;  %v2354_v8 = vld [vmem:[#allocation11 + $0x98] sm:$0xff] }
  0xdd   :  { %1155 = vmatpush.bf16.msra.mxu0 %v1610_v11  ;;  %1168 = vmatpush.bf16.msra.mxu1 %v1738_v12  ;;  %v2353_v12 = vld [vmem:[#allocation11 + $0x90] sm:$0xff] }
  0xdf   :  { %1180 = vmatpush.bf16.msra.mxu2 %v1882_v19 }
  0xe0   :  { %1193 = vmatpush.bf16.msra.mxu3 %v2010_v20 }
  0xe1   :  { %1156 = vmatpush.bf16.msra.mxu0 %v1594_v23  ;;  %1169 = vmatpush.bf16.msra.mxu1 %v1722_v24  ;;  %v347_v24 = vperm.slane %v2654_v63, 1 }
  0xe3   :  { %1181 = vmatpush.bf16.msra.mxu2 %v1866_v32  ;;  %v2364_v32 = vld [vmem:[#allocation11 + $0xe8] sm:$0xff] }
  0xe4   :  { %1194 = vmatpush.bf16.msra.mxu3 %v1994_v33 }
  0xe5   :  { %1157 = vmatpush.bf16.msra.mxu0 %v1578_v37  ;;  %1170 = vmatpush.bf16.msra.mxu1 %v1706_v38  ;;  %v2363_v38 = vld [vmem:[#allocation11 + $0xe0] sm:$0xff] }
  0xe7   :  { %1182 = vmatpush.bf16.msra.mxu2 %v1850_v42 }
  0xe8   :  { %1195 = vmatpush.bf16.msra.mxu3 %v1978_v43  ;;  %1158 = vmatmul.bf16.vlgmr.msra.gmra.mxu0 %v2630_v29  ;;  %v2349_v29 = vld [vmem:[#allocation11 + $0x70] sm:$0xff] }
  0xe9   :  { %1470 = vmatpush.bf16.msrb.mxu0 %v2342_v41  ;;  %1171 = vmatmul.bf16.vlgmr.msra.gmra.mxu1 %v2632_v34  ;;  %v2336_v34 = vld [vmem:[#allocation11 + $0x8] sm:$0xff]  ;;  %v2362_v41 = vld [vmem:[#allocation11 + $0xd8] sm:$0xff] }
  0xea   :  { %1483 = vmatpush.bf16.msrb.mxu1 %v2350_v53 }
  0xeb   :  { %1183 = vmatpush.bf16.msra.mxu2 %v1834_v49 }
  0xec   :  { %1196 = vmatpush.bf16.msra.mxu3 %v1962_v50 }
  0xed   :  { %1471 = vmatpush.bf16.msrb.mxu0 %v2341_v48  ;;  %v2361_v48 = vld [vmem:[#allocation11 + $0xd0] sm:$0xff] }
  0xee   :  { %1184 = vmatmul.bf16.vlgmr.msra.gmra.mxu2 %v2636_v56  ;;  %1484 = vmatpush.bf16.msrb.mxu1 %v2349_v29  ;;  %v2346_v56 = vld [vmem:[#allocation11 + $0x58] sm:$0xff] }
  0xef   :  { %1197 = vmatmul.bf16.vlgmr.msra.gmra.mxu3 %v2638_v62  ;;  %v2358_v62 = vld [vmem:[#allocation11 + $0xb8] sm:$0xff] }
  0xf0   :  { %1496 = vmatpush.bf16.msrb.mxu2 %v2358_v62  ;;  %1509 = vmatpush.bf16.msrb.mxu3 %v2366_v22 }
  0xf1   :  { %1472 = vmatpush.bf16.msrb.mxu0 %v2340_v51 }
  0xf2   :  { %1485 = vmatpush.bf16.msrb.mxu1 %v2348_v57 }
  0xf4   :  { %1497 = vmatpush.bf16.msrb.mxu2 %v2357_v61  ;;  %1510 = vmatpush.bf16.msrb.mxu3 %v2365_v27 }
  0xf5   :  { %1473 = vmatpush.bf16.msrb.mxu0 %v2339_v52  ;;  %v2360_v52 = vld [vmem:[#allocation11 + $0xc8] sm:$0xff] }
  0xf6   :  { %1486 = vmatpush.bf16.msrb.mxu1 %v2347_v59 }
  0xf8   :  { %1498 = vmatpush.bf16.msrb.mxu2 %v2356_v1  ;;  %1511 = vmatpush.bf16.msrb.mxu3 %v2364_v32 }
  0xf9   :  { %1474 = vmatpush.bf16.msrb.mxu0 %v2338_v54 }
  0xfa   :  { %1487 = vmatpush.bf16.msrb.mxu1 %v2346_v56 }
  0xfc   :  { %1499 = vmatpush.bf16.msrb.mxu2 %v2355_v6  ;;  %1512 = vmatpush.bf16.msrb.mxu3 %v2363_v38 }
  0xfd   :  { %1475 = vmatpush.bf16.msrb.mxu0 %v2337_v55 }
  0xfe   :  { %1488 = vmatpush.bf16.msrb.mxu1 %v2345_v60 }
 0x100   :  { %1500 = vmatpush.bf16.msrb.mxu2 %v2354_v8  ;;  %1513 = vmatpush.bf16.msrb.mxu3 %v2362_v41 }
 0x101   :  { %1476 = vmatpush.bf16.msrb.mxu0 %v2336_v34  ;;  %v2359_v34 = vld [vmem:[#allocation11 + $0xc0] sm:$0xff] }
 0x102   :  { %1489 = vmatpush.bf16.msrb.mxu1 %v2344_v0  ;;  %v349_v0 = vperm.slane %v2654_v63, 3  ;;  %v2378_v63 = vld [vmem:[%s2672_s6] ss:$0 sm:$0xff] }
 0x104   :  { %1501 = vmatpush.bf16.msrb.mxu2 %v2353_v12  ;;  %1514 = vmatpush.bf16.msrb.mxu3 %v2361_v48 }
 0x105   :  { %1477 = vmatpush.bf16.msrb.mxu0 %v2335_v58 }
 0x106   :  { %1490 = vmatpush.bf16.msrb.mxu1 %v2343_v5 }
 0x108   :  { %1502 = vmatpush.bf16.msrb.mxu2 %v2352_v16  ;;  %1515 = vmatpush.bf16.msrb.mxu3 %v2360_v52 }
 0x10c   :  { %1503 = vmatpush.bf16.msrb.mxu2 %v2351_v21  ;;  %1516 = vmatpush.bf16.msrb.mxu3 %v2359_v34 }
 0x124   :  { %v1003_v2 = vpop.f32.mrf.mxu0  ;;  %v1016_v3 = vpop.f32.mrf.mxu1 }
 0x125   :  { %v1004_v7 = vadd.f32 %v1003_v2, %v346_v4 }
 0x127   :  { %v1017_v11 = vadd.f32 %v1016_v3, %v1004_v7 }
 0x12c   :  { %v1005_v9 = vpop.f32.mrf.mxu0  ;;  %v1018_v10 = vpop.f32.mrf.mxu1 }
 0x131   :  { %v1029_v13 = vpop.f32.mrf.mxu2 }
 0x132   :  { %v1030_v14 = vadd.f32 %v1029_v13, %v1017_v11  ;;  %v1042_v15 = vpop.f32.mrf.mxu3 }
 0x134   :  { %v1043_v17 = vadd.f32 %v1042_v15, %v1030_v14  ;;  %v1055_v18 = vpop.f32.mrf.mxu0 }
 0x135   :  { %v1068_v19 = vpop.f32.mrf.mxu1  ;;  %v1056_v28 = vadd.f32 %v1055_v18, %v347_v24 }
 0x136   :  { %v1202_v20 = vmax.f32 %v1043_v17, 0.0 }
 0x137   :  { %v1069_v33 = vadd.f32 %v1068_v19, %v1056_v28 }
 0x138   :  { %v1206_v23 = vpack.c.bf16 %v1202_v20, %v1202_v20 }
 0x139   :  { %v1031_v25 = vpop.f32.mrf.mxu2 }
 0x13a   :  { %v1044_v26 = vpop.f32.mrf.mxu3  ;;  %1478 = vmatmul.bf16.vlgmr.msrb.gmra.mxu0 %v1206_v23 }
 0x13c   :  { %v1057_v30 = vpop.f32.mrf.mxu0 }
 0x13d   :  { %v1070_v31 = vpop.f32.mrf.mxu1 }
 0x141   :  { %v1081_v35 = vpop.f32.mrf.mxu2 }
 0x142   :  { %v1082_v36 = vadd.f32 %v1081_v35, %v1069_v33  ;;  %v1094_v37 = vpop.f32.mrf.mxu3 }
 0x144   :  { %v1095_v39 = vadd.f32 %v1094_v37, %v1082_v36 }
 0x145   :  { %v1107_v40 = vpop.f32.mrf.mxu0 }
 0x146   :  { %v1203_v42 = vmax.f32 %v1095_v39, 0.0  ;;  %v1108_v49 = vadd.f32 %v1107_v40, %v348_v45 }
 0x147   :  { %v1120_v43 = vpop.f32.mrf.mxu1 }
 0x148   :  { %v1207_v44 = vpack.c.bf16 %v1203_v42, %v1203_v42  ;;  %v1121_v53 = vadd.f32 %v1120_v43, %v1108_v49 }
 0x149   :  { %v1083_v46 = vpop.f32.mrf.mxu2 }
 0x14a   :  { %v1096_v47 = vpop.f32.mrf.mxu3  ;;  %1491 = vmatmul.bf16.vlgmr.msrb.gmra.mxu1 %v1207_v44 }
 0x14d   :  { %v1109_v50 = vpop.f32.mrf.mxu0 }
 0x14f   :  { %v1122_v51 = vpop.f32.mrf.mxu1 }
 0x151   :  { %v1133_v54 = vpop.f32.mrf.mxu2 }
 0x152   :  { %v1146_v55 = vpop.f32.mrf.mxu3  ;;  %v1134_v29 = vadd.f32 %v1133_v54, %v1121_v53 }
 0x154   :  { %v1147_v57 = vadd.f32 %v1146_v55, %v1134_v29 }
 0x156   :  { %v1204_v58 = vmax.f32 %v1147_v57, 0.0 }
 0x158   :  { %v1208_v59 = vpack.c.bf16 %v1204_v58, %v1204_v58 }
 0x159   :  { %v1135_v56 = vpop.f32.mrf.mxu2 }
 0x15a   :  { %v1148_v62 = vpop.f32.mrf.mxu3  ;;  %1504 = vmatmul.bf16.vlgmr.msrb.gmra.mxu2 %v1208_v59 }
 0x165   :  { %v1159_v60 = vpop.f32.mrf.mxu0 }
 0x166   :  { %v1172_v61 = vpop.f32.mrf.mxu1  ;;  %v1160_v1 = vadd.f32 %v1159_v60, %v349_v0 }
 0x168   :  { %v1173_v4 = vadd.f32 %v1172_v61, %v1160_v1 }
 0x16d   :  { %v1161_v2 = vpop.f32.mrf.mxu0 }
 0x16e   :  { %v1174_v3 = vpop.f32.mrf.mxu1 }
 0x171   :  { %v1185_v5 = vpop.f32.mrf.mxu2 }
 0x172   :  { %v1186_v6 = vadd.f32 %v1185_v5, %v1173_v4  ;;  %v1198_v7 = vpop.f32.mrf.mxu3 }
 0x174   :  { %v1199_v8 = vadd.f32 %v1198_v7, %v1186_v6 }
 0x176   :  { %v1205_v9 = vmax.f32 %v1199_v8, 0.0 }
 0x178   :  { %v1209_v10 = vpack.c.bf16 %v1205_v9, %v1205_v9 }
 0x179   :  { %v1187_v11 = vpop.f32.mrf.mxu2 }
 0x17a   :  { %v1200_v12 = vpop.f32.mrf.mxu3  ;;  %1517 = vmatmul.bf16.vlgmr.msrb.gmra.mxu3 %v1209_v10 }
 0x1b7   :  { %v1479_v13 = vpop.f32.mrf.mxu0 }
 0x1b8   :  { %v1480_v19 = vadd.f32 %v2378_v63, %v1479_v13 }
 0x1bf   :  { %v1481_v14 = vpop.f32.mrf.mxu0 }
 0x1c7   :  { %v1492_v15 = vpop.f32.mrf.mxu1 }
 0x1c8   :  { %v1493_v20 = vadd.f32 %v1492_v15, %v1480_v19 }
 0x1cf   :  { %v1494_v16 = vpop.f32.mrf.mxu1 }
 0x1dd   :  { %v1505_v17 = vpop.f32.mrf.mxu2 }
 0x1de   :  { %v1506_v21 = vadd.f32 %v1505_v17, %v1493_v20 }
 0x1e5   :  { %v1507_v18 = vpop.f32.mrf.mxu2 }
 0x1fd   :  { %v1518_v22 = vpop.f32.mrf.mxu3 }
 0x1fe   :  { %v1519_v23 = vadd.f32 %v1518_v22, %v1506_v21 }
 0x200   :  { %1522 = vst [vmem:[#allocation13] sm:$0x3] %v1519_v23 }
 0x201   :  { %1533 = dma.vmem_to_hbm [thread:$0]  %s1529_s9, 32, %s1531_s12, [#allocation4]  }
 0x205   :  { %v1520_v24 = vpop.f32.mrf.mxu3 }
 0x206   :  { %2555 = dma.done.wait [#allocation4], 32  }
 0x207   :  { %2556 = vsyncadd [#allocation4], 4294967264 }
 0x208   :  { %1538 = vsyncpa [#allocation3], 1 }
 0x209   :  { %1539 = vsyncpa [#allocation6], 1 }
 0x20a   :  { %1540 = vsyncpa [#allocation9], 1 }
 0x20b   :  { %1541 = vsyncpa [#allocation12], 1 }
 0x20c   :  { %1542 = vsyncpa [#allocation4], 1 }

</bundles_post_ra>
